<compile_context>
chip_gen: v7x
topology: tpu7x:2x2x1
jax: 0.10.0
libtpu: 0.0.40
codegen_flags: <defaults>
</compile_context>

<pallas_src>
import functools

import jax
import jax.numpy as jnp
from jax.experimental import pallas as pl
from jax.experimental.pallas import tpu as pltpu

_EPS = 1e-8  # matches torch.nn.functional.cosine_similarity default eps


def _round_up(x, m):
    return ((x + m - 1) // m) * m


def _infonce_kernel(a_ref, p_ref, n_ref, out_ref, *, feat_dim, rows_per_seg,
                    total_rows):
    i = pl.program_id(0)

    a = a_ref[...].astype(jnp.float32)
    p = p_ref[...].astype(jnp.float32)
    n = n_ref[...].astype(jnp.float32)

    tb, lanes = a.shape
    r = rows_per_seg  # original rows packed per dense row (lanes // feat_dim)

    # Segment-sum RHS (lanes, r): column j sums lanes [j*feat_dim, (j+1)*feat_dim).
    # For the non-densified path (r == 1, lanes == feat_dim) this is ones((D, 1)).
    lane_idx = jax.lax.broadcasted_iota(jnp.int32, (lanes, r), 0)
    col_idx = jax.lax.broadcasted_iota(jnp.int32, (lanes, r), 1)
    seg = ((lane_idx >= col_idx * feat_dim)
           & (lane_idx < (col_idx + 1) * feat_dim)).astype(jnp.float32)

    # Four per-row (lane-axis) reductions fused into a single MXU matmul.
    stacked = jnp.concatenate([a * p, a * n, p * p, n * n], axis=0)  # (4*tb, lanes)
    sums = jnp.dot(stacked, seg, preferred_element_type=jnp.float32)  # (4*tb, r)
    dot_ap = sums[0 * tb:1 * tb]
    dot_an = sums[1 * tb:2 * tb]
    sq_p = sums[2 * tb:3 * tb]
    sq_n = sums[3 * tb:4 * tb]

    # norm_a cancels between numerator and denominator of the ratio; skip it.
    np_c = jnp.maximum(jnp.sqrt(sq_p), _EPS)
    nn_c = jnp.maximum(jnp.sqrt(sq_n), _EPS)
    spos = dot_ap / np_c
    sneg = dot_an / nn_c

    # Mask padded rows BEFORE the logs: spos=1, sneg=0 -> per-row loss == 0.
    row_idx = jax.lax.broadcasted_iota(jnp.int32, spos.shape, 0)
    col_j = jax.lax.broadcasted_iota(jnp.int32, spos.shape, 1)
    orig_row = (i * tb + row_idx) * r + col_j
    valid = orig_row < total_rows
    spos = jnp.where(valid, spos, 1.0)
    sneg = jnp.where(valid, sneg, 0.0)

    # -log(spos / (spos + sneg)) == log(spos + sneg) - log(spos)
    loss = jnp.log(spos + sneg) - jnp.log(spos)

    # Per-block partial sum; summed and divided by B in the wrapper.
    out_ref[...] = jnp.sum(loss, keepdims=True)  # (1, 1)


def infonce_loss(anchor, positive, negative):
    """Pallas TPU implementation of InfoNCELoss.forward. Inputs: (B, D)."""
    assert anchor.shape == positive.shape == negative.shape
    assert anchor.ndim == 2
    B, D = anchor.shape
    dtype = anchor.dtype
    itemsize = jnp.dtype(dtype).itemsize
    sublane = max(8, 32 // itemsize)  # 8 f32 / 16 bf16 / 32 int8

    # Lane-densify small feature dims: (B, D) -> (B*D/128, 128).
    if D < 128 and 128 % D == 0:
        rows_per_seg = 128 // D
        lanes = 128
    else:
        rows_per_seg = 1
        lanes = D
    lanes_pad = _round_up(lanes, 128)  # actual VMEM lane footprint

    rows_needed = -(-B // rows_per_seg)  # dense rows required for the batch

    # Generation-aware VMEM budget (real lane-padded footprint, double-buffered
    # inputs + f32 intermediates for the fused product stack).
    try:
        vmem_cap = int(pltpu.get_tpu_info().vmem_capacity_bytes)
    except Exception:
        vmem_cap = 64 * 1024 * 1024  # conservative fallback (v7x per-TC)
    vmem_budget = vmem_cap // 2
    per_row_bytes = lanes_pad * (3 * 2 * itemsize + 10 * 4)
    tb_vmem_cap = max(sublane,
                      (vmem_budget // per_row_bytes) // sublane * sublane)

    # Size block rows by HBM bytes per grid step (~4 MiB) so the ~0.35 us
    # per-step overhead stays well hidden.
    target_step_bytes = 4 * 1024 * 1024
    tb_target = _round_up(max(1, target_step_bytes // (3 * lanes_pad * itemsize)),
                          sublane)

    tb = min(tb_target, tb_vmem_cap, 8192, _round_up(rows_needed, sublane))
    tb = max(sublane, (tb // sublane) * sublane)

    num_blocks = -(-rows_needed // tb)
    rows_pad = num_blocks * tb
    B_pad = rows_pad * rows_per_seg

    if B_pad != B:
        pad = ((0, B_pad - B), (0, 0))
        anchor = jnp.pad(anchor, pad)
        positive = jnp.pad(positive, pad)
        negative = jnp.pad(negative, pad)
    if rows_per_seg > 1:
        anchor = anchor.reshape(rows_pad, lanes)
        positive = positive.reshape(rows_pad, lanes)
        negative = negative.reshape(rows_pad, lanes)

    kernel = functools.partial(_infonce_kernel, feat_dim=D,
                               rows_per_seg=rows_per_seg, total_rows=B)

    footprint = tb * per_row_bytes
    vmem_limit = int(min(vmem_cap * 85 // 100,
                         max(footprint + 8 * 1024 * 1024, 16 * 1024 * 1024)))

    cost = pl.CostEstimate(
        flops=int(12 * rows_pad * lanes),
        transcendentals=int(4 * B),
        bytes_accessed=int(3 * rows_pad * lanes * itemsize + 4 * num_blocks),
    )

    partial = pl.pallas_call(
        kernel,
        out_shape=jax.ShapeDtypeStruct((num_blocks, 1), jnp.float32),
        grid=(num_blocks,),
        in_specs=[
            pl.BlockSpec((tb, lanes), lambda i: (i, 0)),
            pl.BlockSpec((tb, lanes), lambda i: (i, 0)),
            pl.BlockSpec((tb, lanes), lambda i: (i, 0)),
        ],
        out_specs=pl.BlockSpec((1, 1), lambda i: (i, 0)),
        compiler_params=pltpu.CompilerParams(
            dimension_semantics=("parallel",),
            vmem_limit_bytes=vmem_limit,
        ),
        cost_estimate=cost,
    )(anchor, positive, negative)

    return jnp.sum(partial) / B


def _infonce_loss_ref(anchor, positive, negative):
    """Pure-JAX reference mirroring the PyTorch module."""
    def cos(x, y):
        dot = jnp.sum(x * y, axis=1)
        nx = jnp.maximum(jnp.linalg.norm(x, axis=1), _EPS)
        ny = jnp.maximum(jnp.linalg.norm(y, axis=1), _EPS)
        return dot / (nx * ny)

    sim_pos = cos(anchor, positive)
    sim_neg = cos(anchor, negative)
    return -jnp.log(sim_pos / (sim_pos + sim_neg)).mean()


if __name__ == "__main__":
    key = jax.random.PRNGKey(0)
    keys = jax.random.split(key, 9)

    # Non-negative features guarantee sim_pos > 0 and sim_pos + sim_neg > 0,
    # so the reference loss is finite (the raw module NaNs on arbitrary signs;
    # that behavior is faithfully shared by the kernel).

    # Test 1: small batch, small D (lane-densified path).
    B, D = 8, 32
    a1 = jax.random.uniform(keys[0], (B, D), jnp.float32, minval=0.1, maxval=1.0)
    p1 = jax.random.uniform(keys[1], (B, D), jnp.float32, minval=0.1, maxval=1.0)
    n1 = jax.random.uniform(keys[2], (B, D), jnp.float32, minval=0.1, maxval=1.0)
    loss1 = infonce_loss(a1, p1, n1)
    jax.block_until_ready(loss1)
    ref1 = _infonce_loss_ref(a1, p1, n1)
    assert jnp.allclose(loss1, ref1, rtol=1e-5, atol=1e-5), (loss1, ref1)

    # Test 2: batch not a multiple of the dense-row packing (padding/mask path).
    B2, D2 = 13, 32
    a2 = jax.random.uniform(keys[3], (B2, D2), jnp.float32, minval=0.1, maxval=1.0)
    p2 = jax.random.uniform(keys[4], (B2, D2), jnp.float32, minval=0.1, maxval=1.0)
    n2 = jax.random.uniform(keys[5], (B2, D2), jnp.float32, minval=0.1, maxval=1.0)
    loss2 = infonce_loss(a2, p2, n2)
    jax.block_until_ready(loss2)
    ref2 = _infonce_loss_ref(a2, p2, n2)
    assert jnp.allclose(loss2, ref2, rtol=1e-5, atol=1e-5), (loss2, ref2)

    # Test 3: D >= 128 (non-densified path) with ragged batch.
    B3, D3 = 13, 256
    a3 = jax.random.uniform(keys[6], (B3, D3), jnp.float32, minval=0.1, maxval=1.0)
    p3 = jax.random.uniform(keys[7], (B3, D3), jnp.float32, minval=0.1, maxval=1.0)
    n3 = jax.random.uniform(keys[8], (B3, D3), jnp.float32, minval=0.1, maxval=1.0)
    loss3 = infonce_loss(a3, p3, n3)
    jax.block_until_ready(loss3)
    ref3 = _infonce_loss_ref(a3, p3, n3)
    assert jnp.allclose(loss3, ref3, rtol=1e-5, atol=1e-5), (loss3, ref3)

    print("KERNEL_OK")
</pallas_src>

<mosaic_0001>
module attributes {stable_mosaic.version = 11 : i64} {
  func.func @_infonce_kernel(%arg0: i32, %arg1: memref<8x128xf32, #tpu.memory_space<vmem>>, %arg2: memref<8x128xf32, #tpu.memory_space<vmem>>, %arg3: memref<8x128xf32, #tpu.memory_space<vmem>>, %arg4: memref<1x1xf32, #tpu.memory_space<vmem>>) attributes {dimension_semantics = [#tpu.dimension_semantics<parallel>], iteration_bounds = array<i64: 1>, scalar_prefetch = 0 : i64, scratch_operands = 0 : i64, tpu.core_type = #tpu.core_type<tc>, window_params = [{transform_indices = @transform_0, window_bounds = array<i64: 8, 128>}, {transform_indices = @transform_1, window_bounds = array<i64: 8, 128>}, {transform_indices = @transform_2, window_bounds = array<i64: 8, 128>}, {transform_indices = @transform_3, window_bounds = array<i64: 1, 1>}]} {
    %c0 = arith.constant 0 : index
    %c0_0 = arith.constant 0 : index
    %0 = vector.load %arg1[%c0, %c0_0] : memref<8x128xf32, #tpu.memory_space<vmem>>, vector<8x128xf32>
    %c0_1 = arith.constant 0 : index
    %c0_2 = arith.constant 0 : index
    %1 = vector.load %arg2[%c0_1, %c0_2] : memref<8x128xf32, #tpu.memory_space<vmem>>, vector<8x128xf32>
    %c0_3 = arith.constant 0 : index
    %c0_4 = arith.constant 0 : index
    %2 = vector.load %arg3[%c0_3, %c0_4] : memref<8x128xf32, #tpu.memory_space<vmem>>, vector<8x128xf32>
    %3 = tpu.iota {dimensions = array<i32: 0>} : vector<128x4xi32>
    %4 = tpu.iota {dimensions = array<i32: 1>} : vector<128x4xi32>
    %c32_i32 = arith.constant 32 : i32
    %5 = vector.broadcast %c32_i32 : i32 to vector<128x4xi32>
    %6 = arith.muli %4, %5 : vector<128x4xi32>
    %7 = arith.cmpi sge, %3, %6 : vector<128x4xi32>
    %c1_i32 = arith.constant 1 : i32
    %8 = vector.broadcast %c1_i32 : i32 to vector<128x4xi32>
    %9 = arith.addi %4, %8 : vector<128x4xi32>
    %c32_i32_5 = arith.constant 32 : i32
    %10 = vector.broadcast %c32_i32_5 : i32 to vector<128x4xi32>
    %11 = arith.muli %9, %10 : vector<128x4xi32>
    %12 = arith.cmpi slt, %3, %11 : vector<128x4xi32>
    %13 = arith.andi %7, %12 : vector<128x4xi1>
    %14 = arith.extui %13 : vector<128x4xi1> to vector<128x4xi32>
    %15 = arith.sitofp %14 : vector<128x4xi32> to vector<128x4xf32>
    %16 = arith.mulf %0, %1 : vector<8x128xf32>
    %17 = arith.mulf %0, %2 : vector<8x128xf32>
    %18 = arith.mulf %1, %1 : vector<8x128xf32>
    %19 = arith.mulf %2, %2 : vector<8x128xf32>
    %20 = tpu.concatenate %16, %17, %18, %19 in 0 : vector<8x128xf32>, vector<8x128xf32>, vector<8x128xf32>, vector<8x128xf32> -> vector<32x128xf32>
    %cst = arith.constant dense<0.000000e+00> : vector<32x4xf32>
    %21 = tpu.matmul %20, %15, %cst {dimension_numbers = #tpu.dot_dimension_numbers<[1], [0], [0], [1], [0, 0, 1, 1], [], []>} : vector<32x128xf32>, vector<128x4xf32>, vector<32x4xf32> -> vector<32x4xf32>
    %22 = vector.extract_strided_slice %21 {offsets = [0, 0], sizes = [8, 4], strides = [1, 1]} : vector<32x4xf32> to vector<8x4xf32>
    %23 = vector.extract_strided_slice %21 {offsets = [8, 0], sizes = [8, 4], strides = [1, 1]} : vector<32x4xf32> to vector<8x4xf32>
    %24 = vector.extract_strided_slice %21 {offsets = [16, 0], sizes = [8, 4], strides = [1, 1]} : vector<32x4xf32> to vector<8x4xf32>
    %25 = vector.extract_strided_slice %21 {offsets = [24, 0], sizes = [8, 4], strides = [1, 1]} : vector<32x4xf32> to vector<8x4xf32>
    %26 = math.sqrt %24 : vector<8x4xf32>
    %cst_6 = arith.constant 9.99999993E-9 : f32
    %27 = vector.broadcast %cst_6 : f32 to vector<8x4xf32>
    %28 = arith.maximumf %26, %27 : vector<8x4xf32>
    %29 = math.sqrt %25 : vector<8x4xf32>
    %cst_7 = arith.constant 9.99999993E-9 : f32
    %30 = vector.broadcast %cst_7 : f32 to vector<8x4xf32>
    %31 = arith.maximumf %29, %30 : vector<8x4xf32>
    %32 = arith.divf %22, %28 : vector<8x4xf32>
    %33 = arith.divf %23, %31 : vector<8x4xf32>
    %34 = tpu.iota {dimensions = array<i32: 0>} : vector<8x4xi32>
    %35 = tpu.iota {dimensions = array<i32: 1>} : vector<8x4xi32>
    %c8_i32 = arith.constant 8 : i32
    %36 = arith.muli %arg0, %c8_i32 : i32
    %37 = vector.broadcast %36 : i32 to vector<8x4xi32>
    %38 = arith.addi %37, %34 : vector<8x4xi32>
    %c4_i32 = arith.constant 4 : i32
    %39 = vector.broadcast %c4_i32 : i32 to vector<8x4xi32>
    %40 = arith.muli %38, %39 : vector<8x4xi32>
    %41 = arith.addi %40, %35 : vector<8x4xi32>
    %c8_i32_8 = arith.constant 8 : i32
    %42 = vector.broadcast %c8_i32_8 : i32 to vector<8x4xi32>
    %43 = arith.cmpi slt, %41, %42 : vector<8x4xi32>
    %cst_9 = arith.constant 1.000000e+00 : f32
    %44 = vector.broadcast %cst_9 : f32 to vector<8x4xf32>
    %45 = arith.select %43, %32, %44 : vector<8x4xi1>, vector<8x4xf32>
    %cst_10 = arith.constant 0.000000e+00 : f32
    %46 = vector.broadcast %cst_10 : f32 to vector<8x4xf32>
    %47 = arith.select %43, %33, %46 : vector<8x4xi1>, vector<8x4xf32>
    %48 = arith.addf %45, %47 : vector<8x4xf32>
    %49 = math.log %48 : vector<8x4xf32>
    %50 = math.log %45 : vector<8x4xf32>
    %51 = arith.subf %49, %50 : vector<8x4xf32>
    %52 = vector.shape_cast %51 : vector<8x4xf32> to vector<1x8x4xf32>
    %cst_11 = arith.constant dense<0.000000e+00> : vector<1xf32>
    %53 = vector.multi_reduction <add>, %52, %cst_11 [1, 2] : vector<1x8x4xf32> to vector<1xf32>
    %54 = vector.shape_cast %53 : vector<1xf32> to vector<1x1x1xf32>
    %55 = vector.extract %54[0, 0, 0] : f32 from vector<1x1x1xf32>
    %56 = vector.broadcast %55 : f32 to vector<1x1xf32>
    %c0_12 = arith.constant 0 : index
    %c0_13 = arith.constant 0 : index
    %57 = vector.load %arg4[%c0_12, %c0_13] : memref<1x1xf32, #tpu.memory_space<vmem>>, vector<1x1xf32>
    tpu.vector_store %arg4[%c0_12, %c0_13], %56 {strides = array<i32>} : memref<1x1xf32, #tpu.memory_space<vmem>>, vector<1x1xf32>,
    return
  }
  func.func @transform_0(%arg0: i32) -> (i32, i32) {
    %c0_i32 = arith.constant 0 : i32
    %c0_i32_0 = arith.constant 0 : i32
    return %arg0, %c0_i32 : i32, i32
  }
  func.func @transform_1(%arg0: i32) -> (i32, i32) {
    %c0_i32 = arith.constant 0 : i32
    %c0_i32_0 = arith.constant 0 : i32
    return %arg0, %c0_i32 : i32, i32
  }
  func.func @transform_2(%arg0: i32) -> (i32, i32) {
    %c0_i32 = arith.constant 0 : i32
    %c0_i32_0 = arith.constant 0 : i32
    return %arg0, %c0_i32 : i32, i32
  }
  func.func @transform_3(%arg0: i32) -> (i32, i32) {
    %c0_i32 = arith.constant 0 : i32
    %c0_i32_0 = arith.constant 0 : i32
    return %arg0, %c0_i32 : i32, i32
  }
}

</mosaic_0001>

<bundles_post_ra>
// kernel: tpu_custom_call.1
= control target key start
LH: loop header
LB: loop body
LE: loop exit
PB: predicated region body
PF: predicated region fallthrough
CT: control target
= control target key end

     0   :  { %8 = vsyncpa [#allocation3], 0  ;;  %s801_s0 = inlined_call_operand.hbm [shape: f32[8,128], index: 0, kind: input, shape index: {}]   ;;  %s802_s1 = inlined_call_operand.hbm [shape: f32[8,128], index: 1, kind: input, shape index: {}]   ;;  %s803_s2 = inlined_call_operand.hbm [shape: f32[8,128], index: 2, kind: input, shape index: {}]   ;;  %s804_s3 = inlined_call_operand.hbm [shape: f32[1,1], index: 3, kind: output, shape index: {}]  }
   0x1   :  { %9 = vsyncpa [#allocation6], 0 }
   0x2   :  { %10 = vsyncpa [#allocation4], 0  ;;  %s559_s12 = smov [#allocation5]   ;;  %s560_s14 = smov [#allocation2]  }
   0x3   :  { %s27_s13 = sshll.u32 %s559_s12, 4  ;;  %s17_s15 = sshll.u32 %s560_s14, 4  ;;  %s28_s13 = int_to_ptr.vmem [resolvable:$true] %s27_s13  ;;  %s18_s15 = int_to_ptr.vmem [resolvable:$true] %s17_s15 }
   0x4   :  { %s465_s18 = scalar_lea.hbm %s802_s1, 128 }
   0x5   :  { %p466_p0 = scmp.ne.s32.totalorder %s802_s1, %s465_s18  ;;  %p469_p1 = scmp.lt.u32.totalorder %s465_s18, %s802_s1 }
   0x7   :  { %p471_p2 = pnand %p469_p1, %p466_p0 }
   0x9   :  { %474 = shalt.err (!%p471_p2)
}
   0xa   :  { %s475_s23 = scalar_lea.vmem %s28_s13, 128  ;;  %p480_p4 = scmp.lt.s32.totalorder %s28_s13, %s28_s13 }
   0xb   :  { %p476_p3 = scmp.ne.s32.totalorder %s28_s13, %s475_s23  ;;  %p481_p5 = scmp.lt.s32.totalorder %s475_s23, %s475_s23 }
   0xd   :  { %p482_p6 = por %p481_p5, %p480_p4 }
   0xf   :  { %p483_p7 = pnand %p482_p6, %p476_p3 }
  0x11   :  { %486 = shalt.err (!%p483_p7)
}
  0x12   :  { %30 = dma.hbm_to_vmem [thread:$0]  %s802_s1, 128, %s28_s13, [#allocation6]  }
  0x13   :  { %s487_s28 = scalar_lea.hbm %s801_s0, 128 }
  0x14   :  { %p488_p8 = scmp.ne.s32.totalorder %s801_s0, %s487_s28  ;;  %p491_p9 = scmp.lt.u32.totalorder %s487_s28, %s801_s0 }
  0x16   :  { %p493_p10 = pnand %p491_p9, %p488_p8 }
  0x18   :  { %496 = shalt.err (!%p493_p10)
}
  0x19   :  { %s497_s6 = scalar_lea.vmem %s18_s15, 128  ;;  %p502_p12 = scmp.lt.s32.totalorder %s18_s15, %s18_s15 }
  0x1a   :  { %p498_p11 = scmp.ne.s32.totalorder %s18_s15, %s497_s6  ;;  %p503_p13 = scmp.lt.s32.totalorder %s497_s6, %s497_s6 }
  0x1c   :  { %p504_p0 = por %p503_p13, %p502_p12 }
  0x1e   :  { %p505_p1 = pnand %p504_p0, %p498_p11 }
  0x20   :  { %508 = shalt.err (!%p505_p1)
}
  0x21   :  { %20 = dma.hbm_to_vmem [thread:$0]  %s801_s0, 128, %s18_s15, [#allocation3]  }
  0x22   :  { %s561_s8 = smov [#allocation7]   ;;  %s509_s12 = scalar_lea.hbm %s803_s2, 128 }
  0x23   :  { %s37_s9 = sshll.u32 %s561_s8, 4  ;;  %p510_p2 = scmp.ne.s32.totalorder %s803_s2, %s509_s12  ;;  %s38_s9 = int_to_ptr.vmem [resolvable:$true] %s37_s9 }
  0x24   :  { %p513_p3 = scmp.lt.u32.totalorder %s509_s12, %s803_s2 }
  0x26   :  { %p515_p4 = pnand %p513_p3, %p510_p2 }
  0x28   :  { %518 = shalt.err (!%p515_p4)
}
  0x29   :  { %s519_s18 = scalar_lea.vmem %s38_s9, 128  ;;  %p524_p6 = scmp.lt.s32.totalorder %s38_s9, %s38_s9 }
  0x2a   :  { %p520_p5 = scmp.ne.s32.totalorder %s38_s9, %s519_s18  ;;  %p525_p7 = scmp.lt.s32.totalorder %s519_s18, %s519_s18 }
  0x2c   :  { %p526_p8 = por %p525_p7, %p524_p6 }
  0x2e   :  { %p527_p9 = pnand %p526_p8, %p520_p5 }
  0x30   :  { %530 = shalt.err (!%p527_p9)
}
  0x31   :  { %40 = dma.hbm_to_vmem [thread:$0]  %s803_s2, 128, %s38_s9, [#allocation6]  }
  0x32   :  { %553 = dma.done.wait [#allocation3], 128  }
  0x33   :  { %554 = vsyncadd [#allocation3], 4294967168  ;;  %v53_v0 = vlaneseq }
  0x34   :  { %555 = dma.done.wait [#allocation6], 256  }
  0x35   :  { %556 = vsyncadd [#allocation6], 4294967040  ;;  %v620_v1 = vshrl.u32 %v53_v0, 7  ;;  %v622_v2 = vand.u32 127, %v53_v0  ;;  %v562_v13 = vmov 1.0|1.0  }
  0x36   :  { %v51_v15 = vld [vmem:[#allocation5] sm:$0xff]  ;;  %v661_v16 = vld [vmem:[#allocation2] sm:$0xff]  ;;  %v52_v32 = vld [vmem:[#allocation7] sm:$0xff]  ;;  %s563_s2 = smov [#allocation8]  }
  0x37   :  { %v55_v3 = vadd.s32 8, %v620_v1  ;;  %v626_v4 = vmul.u32 32, %v622_v2  ;;  %v89_v5 = vadd.s32 1, %v622_v2  ;;  %v56_v6 = vadd.s32 16, %v620_v1  ;;  %s298_s19 = sshll.u32 %s563_s2, 4  ;;  %s299_s19 = int_to_ptr.vmem [resolvable:$true] %s298_s19 }
  0x38   :  { %v57_v8 = vadd.s32 24, %v620_v1  ;;  %v58_v9 = vadd.s32 32, %v620_v1  ;;  %v59_v10 = vadd.s32 40, %v620_v1  ;;  %v60_v12 = vadd.s32 48, %v620_v1  ;;  %s531_s21 = scalar_lea.vmem %s299_s19, 16  ;;  %s535_s22 = scalar_lea.vmem %s299_s19, 32 }
  0x39   :  { %vm73_vm0 = vcmp.ge.s32.totalorder %v620_v1, %v626_v4  ;;  %v632_v7 = vmul.u32 32, %v89_v5  ;;  %vm74_vm1 = vcmp.ge.s32.totalorder %v55_v3, %v626_v4  ;;  %vm75_vm5 = vcmp.ge.s32.totalorder %v56_v6, %v626_v4  ;;  %p532_p10 = scmp.ne.s32.totalorder %s299_s19, %s531_s21  ;;  %p536_p11 = scmp.lt.s32.totalorder %s299_s19, %s299_s19 }
  0x3a   :  { %vm76_vm8 = vcmp.ge.s32.totalorder %v57_v8, %v626_v4  ;;  %vm77_vm12 = vcmp.ge.s32.totalorder %v58_v9, %v626_v4  ;;  %v61_v14 = vadd.s32 56, %v620_v1  ;;  %vm78_vm15 = vcmp.ge.s32.totalorder %v59_v10, %v626_v4  ;;  %p537_p12 = scmp.lt.s32.totalorder %s535_s22, %s531_s21 }
  0x3b   :  { %vm91_vm2 = vcmp.lt.s32.totalorder %v620_v1, %v632_v7  ;;  %vm92_vm3 = vcmp.lt.s32.totalorder %v55_v3, %v632_v7  ;;  %vm93_vm6 = vcmp.lt.s32.totalorder %v56_v6, %v632_v7  ;;  %vm94_vm9 = vcmp.lt.s32.totalorder %v57_v8, %v632_v7 }
  0x3c   :  { %vm107_vm4 = vmand %vm73_vm0, %vm91_vm2  ;;  %vm95_vm13 = vcmp.lt.s32.totalorder %v58_v9, %v632_v7  ;;  %vm96_vm0 = vcmp.lt.s32.totalorder %v59_v10, %v632_v7  ;;  %v62_v18 = vadd.s32 64, %v620_v1  ;;  %v63_v19 = vadd.s32 72, %v620_v1  ;;  %p538_p13 = por %p537_p12, %p536_p11 }
  0x3d   :  { %vm108_vm7 = vmand %vm74_vm1, %vm92_vm3  ;;  %vm79_vm3 = vcmp.ge.s32.totalorder %v60_v12, %v626_v4  ;;  %v157_v20 = vmul.f32 %v51_v15, %v51_v15  ;;  %v155_v21 = vmul.f32 %v51_v15, %v661_v16  ;;  %v64_v23 = vadd.s32 80, %v620_v1 }
  0x3e   :  { %vm645_vm10 = vmpackc.low %vm108_vm7, %vm107_vm4  ;;  %vm97_vm4 = vcmp.lt.s32.totalorder %v60_v12, %v632_v7  ;;  %vm98_vm7 = vcmp.lt.s32.totalorder %v61_v14, %v632_v7  ;;  %v65_v24 = vadd.s32 88, %v620_v1  ;;  %v66_v26 = vadd.s32 96, %v620_v1  ;;  %p539_p0 = pnand %p538_p13, %p532_p10 }
  0x3f   :  { %430 = vmatprep.subr.msk.bf16.mxu1 %vm645_vm10, %v562_v13  ;;  %vm109_vm11 = vmand %vm75_vm5, %vm93_vm6  ;;  %399 = vmatprep.subr.msk.bf16.mxu0 %vm645_vm10, %v562_v13  ;;  %vm80_vm6 = vcmp.ge.s32.totalorder %v61_v14, %v626_v4  ;;  %v67_v27 = vadd.s32 104, %v620_v1  ;;  %v68_v29 = vadd.s32 112, %v620_v1  ;;  %v69_v30 = vadd.s32 120, %v620_v1 }
  0x40   :  { %438 = vmatpush3.bf16.msk.msra.mxu1 %vm645_vm10, %v562_v13  ;;  %vm110_vm14 = vmand %vm76_vm8, %vm94_vm9  ;;  %401 = vmatpush3.bf16.msk.msra.mxu0 %vm645_vm10, %v562_v13  ;;  %vm81_vm10 = vcmp.ge.s32.totalorder %v62_v18, %v626_v4  ;;  %v158_v33 = vmul.f32 %v52_v32, %v52_v32  ;;  %v156_v34 = vmul.f32 %v52_v32, %v661_v16  ;;  %v267_v51 = vmul.u32 4, %v620_v1 }
  0x41   :  { %vm663_vm1 = vmpackc.low %vm110_vm14, %vm109_vm11  ;;  %vm99_vm11 = vcmp.lt.s32.totalorder %v62_v18, %v632_v7  ;;  %395 = vmatprep.mubr.f32.mxu1 %v157_v20  ;;  %vm100_vm14 = vcmp.lt.s32.totalorder %v63_v19, %v632_v7  ;;  %392 = vmatprep.mubr.f32.mxu0 %v155_v21 }
  0x42   :  { %431 = vmatprep.subr.msk.bf16.mxu1 %vm663_vm1, %v562_v13  ;;  %vm111_vm2 = vmand %vm77_vm12, %vm95_vm13  ;;  %403 = vmatprep.subr.msk.bf16.mxu0 %vm663_vm1, %v562_v13  ;;  %vm82_vm13 = vcmp.ge.s32.totalorder %v63_v19, %v626_v4  ;;  %v268_v52 = vadd.s32 %v267_v51, %v622_v2 }
  0x43   :  { %vm112_vm5 = vmand %vm78_vm15, %vm96_vm0 }
  0x44   :  { %439 = vmatpush3.bf16.msk.msra.mxu1 %vm663_vm1, %v562_v13  ;;  %vm689_vm8 = vmpackc.low %vm112_vm5, %vm111_vm2  ;;  %405 = vmatpush3.bf16.msk.msra.mxu0 %vm663_vm1, %v562_v13  ;;  %vm83_vm2 = vcmp.ge.s32.totalorder %v64_v23, %v626_v4  ;;  %vm101_vm1 = vcmp.lt.s32.totalorder %v64_v23, %v632_v7  ;;  %vm102_vm5 = vcmp.lt.s32.totalorder %v65_v24, %v632_v7 }
  0x45   :  { %432 = vmatprep.subr.msk.bf16.mxu1 %vm689_vm8, %v562_v13  ;;  %vm113_vm9 = vmand %vm79_vm3, %vm97_vm4  ;;  %407 = vmatprep.subr.msk.bf16.mxu0 %vm689_vm8, %v562_v13  ;;  %vm84_vm4 = vcmp.ge.s32.totalorder %v65_v24, %v626_v4 }
  0x46   :  { %vm114_vm12 = vmand %vm80_vm6, %vm98_vm7 }
  0x47   :  { %vm705_vm15 = vmpackc.low %vm114_vm12, %vm113_vm9  ;;  %vm85_vm9 = vcmp.ge.s32.totalorder %v66_v26, %v626_v4  ;;  %vm86_vm12 = vcmp.ge.s32.totalorder %v67_v27, %v626_v4 }
  0x48   :  { %440 = vmatpush3.bf16.msk.msra.mxu1 %vm689_vm8, %v562_v13  ;;  %vm115_vm0 = vmand %vm81_vm10, %vm99_vm11  ;;  %409 = vmatpush3.bf16.msk.msra.mxu0 %vm689_vm8, %v562_v13  ;;  %vm103_vm10 = vcmp.lt.s32.totalorder %v66_v26, %v632_v7  ;;  %vm104_vm8 = vcmp.lt.s32.totalorder %v67_v27, %v632_v7 }
  0x49   :  { %433 = vmatprep.subr.msk.bf16.mxu1 %vm705_vm15, %v562_v13  ;;  %vm116_vm3 = vmand %vm82_vm13, %vm100_vm14  ;;  %411 = vmatprep.subr.msk.bf16.mxu0 %vm705_vm15, %v562_v13 }
  0x4a   :  { %vm724_vm6 = vmpackc.low %vm116_vm3, %vm115_vm0  ;;  %vm88_vm3 = vcmp.ge.s32.totalorder %v69_v30, %v626_v4 }
  0x4b   :  { %vm117_vm7 = vmand %vm83_vm2, %vm101_vm1  ;;  %vm87_vm2 = vcmp.ge.s32.totalorder %v68_v29, %v626_v4  ;;  %vm105_vm1 = vcmp.lt.s32.totalorder %v68_v29, %v632_v7 }
  0x4c   :  { %441 = vmatpush3.bf16.msk.msra.mxu1 %vm705_vm15, %v562_v13  ;;  %vm118_vm11 = vmand %vm84_vm4, %vm102_vm5  ;;  %413 = vmatpush3.bf16.msk.msra.mxu0 %vm705_vm15, %v562_v13  ;;  %vm106_vm4 = vcmp.lt.s32.totalorder %v69_v30, %v632_v7 }
  0x4d   :  { %434 = vmatprep.subr.msk.bf16.mxu1 %vm724_vm6, %v562_v13  ;;  %vm746_vm13 = vmpackc.low %vm118_vm11, %vm117_vm7  ;;  %415 = vmatprep.subr.msk.bf16.mxu0 %vm724_vm6, %v562_v13 }
  0x4e   :  { %vm119_vm14 = vmand %vm85_vm9, %vm103_vm10 }
  0x4f   :  { %vm120_vm0 = vmand %vm86_vm12, %vm104_vm8  ;;  %vm269_vm8 = vcmp.lt.s32.totalorder %v268_v52, 8 }
  0x50   :  { %442 = vmatpush3.bf16.msk.msra.mxu1 %vm724_vm6, %v562_v13  ;;  %vm422_vm15 = vmpackc.low %vm120_vm0, %vm119_vm14  ;;  %417 = vmatpush3.bf16.msk.msra.mxu0 %vm724_vm6, %v562_v13  ;;  %vm290_vm14 = vcmask 0  }
  0x51   :  { %435 = vmatprep.subr.msk.bf16.mxu1 %vm746_vm13, %v562_v13  ;;  %vm121_vm5 = vmand %vm87_vm2, %vm105_vm1  ;;  %419 = vmatprep.subr.msk.bf16.mxu0 %vm746_vm13, %v562_v13 }
  0x52   :  { %vm122_vm7 = vmand %vm88_vm3, %vm106_vm4 }
  0x53   :  { %vm426_vm9 = vmpackc.low %vm122_vm7, %vm121_vm5 }
  0x54   :  { %443 = vmatpush3.bf16.msk.msra.mxu1 %vm746_vm13, %v562_v13  ;;  %421 = vmatpush3.bf16.msk.msra.mxu0 %vm746_vm13, %v562_v13  ;;  %vm278_vm13 = vcmask 31744  }
  0x55   :  { %436 = vmatprep.subr.msk.bf16.mxu1 %vm422_vm15, %v562_v13  ;;  %423 = vmatprep.subr.msk.bf16.mxu0 %vm422_vm15, %v562_v13 }
  0x58   :  { %444 = vmatpush3.bf16.msk.msra.mxu1 %vm422_vm15, %v562_v13  ;;  %425 = vmatpush3.bf16.msk.msra.mxu0 %vm422_vm15, %v562_v13 }
  0x59   :  { %437 = vmatprep.subr.msk.bf16.mxu1 %vm426_vm9, %v562_v13  ;;  %427 = vmatprep.subr.msk.bf16.mxu0 %vm426_vm9, %v562_v13 }
  0x5c   :  { %445 = vmatpush3.bf16.msk.msra.mxu1 %vm426_vm9, %v562_v13  ;;  %429 = vmatpush3.bf16.msk.msra.mxu0 %vm426_vm9, %v562_v13 }
  0x5f   :  { %396 = vmatmul.mubr.f32.vlgmr.msra.gmra.mrb[0].mxu1 %v158_v33  ;;  %393 = vmatmul.mubr.f32.vlgmr.msra.gmra.mrb[0].mxu0 %v156_v34 }
 0x132   :  { %v397_v35 = vpop.f32.mrb[0].mxu1  ;;  %v394_v37 = vpop.f32.mrb[0].mxu0 }
 0x133   :  { %453 = vrsqrt.f32 %v397_v35  ;;  %v235_v36 = vpop.f32.mrb[1].mxu1  ;;  %v225_v38 = vpop.f32.mrb[1].mxu0  ;;  %vm254_vm6 = vcmp.eq.f32.partialorder %v397_v35, inf  ;;  %v257_v42 = vand.u32 2147483648, %v397_v35  ;;  %vm256_vm10 = vcmp.eq.f32.partialorder %v397_v35, 0.0 }
 0x134   :  { %455 = vrsqrt.f32 %v235_v36  ;;  %vm246_vm11 = vcmp.eq.f32.partialorder %v235_v36, inf  ;;  %v249_v45 = vand.u32 2147483648, %v235_v36  ;;  %vm248_vm12 = vcmp.eq.f32.partialorder %v235_v36, 0.0 }
 0x13d   :  { %v454_v39 = vpop.eup %453 }
 0x13e   :  { %v456_v40 = vpop.eup %455  ;;  %v253_v41 = vmul.f32 %v454_v39, %v397_v35 }
 0x13f   :  { %v245_v43 = vmul.f32 %v456_v40, %v235_v36 }
 0x140   :  { %v255_v44 = vsel %vm254_vm6, %v397_v35, %v253_v41 }
 0x141   :  { %v247_v46 = vsel %vm246_vm11, %v235_v36, %v245_v43  ;;  %v258_v47 = vsel %vm256_vm10, %v257_v42, %v255_v44 }
 0x142   :  { %v250_v48 = vsel %vm248_vm12, %v249_v45, %v247_v46  ;;  %v259_v49 = vmax.f32 %v258_v47, 1e-08 }
 0x143   :  { %v251_v50 = vmax.f32 %v250_v48, 1e-08 }
 0x144   :  { %457 = vrcp.f32 %v259_v49 }
 0x145   :  { %459 = vrcp.f32 %v251_v50 }
 0x14e   :  { %v458_v53 = vpop.eup %457 }
 0x14f   :  { %v460_v54 = vpop.eup %459  ;;  %v263_v55 = vmul.f32 %v458_v53, %v394_v37 }
 0x150   :  { %v261_v56 = vmul.f32 %v460_v54, %v225_v38 }
 0x151   :  { %v271_v57 = vsel %vm269_vm8, %v263_v55, 0.0 }
 0x152   :  { %v270_v58 = vsel %vm269_vm8, %v261_v56, 1.0 }
 0x153   :  { %v272_v59 = vadd.f32 %v271_v57, %v270_v58  ;;  %461 = vlog2.f32 %v270_v58 }
 0x155   :  { %463 = vlog2.f32 %v272_v59 }
 0x15d   :  { %v462_v60 = vpop.eup %461 }
 0x15e   :  { %v276_v63 = vmul.f32 0.6931472, %v462_v60 }
 0x15f   :  { %v464_v61 = vpop.eup %463 }
 0x160   :  { %v274_v62 = vmul.f32 0.6931472, %v464_v61 }
 0x162   :  { %v277_v0 = vsub.f32 %v274_v62, %v276_v63 }
 0x164   :  { %v279_v3 = vsel %vm278_vm13, %v277_v0, 0.0 }
 0x165   :  { %280 = vadd.xlane.f32.xlu0 %v279_v3 }
 0x1f2   :  { %v281_v1 = vpop.xlane.xlu0 %280 }
 0x1f3   :  { %v282_v2 = vrot.slane %v281_v1, 4 }
 0x1f5   :  { %v283_v4 = vadd.f32 %v282_v2, %v281_v1 }
 0x1f7   :  { %v284_v5 = vrot.slane %v283_v4, 2 }
 0x1f9   :  { %v285_v6 = vadd.f32 %v284_v5, %v283_v4 }
 0x1fb   :  { %v286_v7 = vrot.slane %v285_v6, 1 }
 0x1fd   :  { %v287_v8 = vadd.f32 %v286_v7, %v285_v6 }
 0x1ff   :  { %446 = vpush %v287_v8 }
 0x230   :  { %s447_s20 = spop %446 }
 0x231   :  { %v289_v9 = vstv %s447_s20 }
 0x232   :  { %291 = vst.msk [vmem:[#allocation8] sm:$0x1] %vm290_vm14, %v289_v9 }
 0x233   :  { %542 = shalt.err (!%p539_p0)
}
 0x234   :  { %s543_s25 = scalar_lea.hbm %s804_s3, 16 }
 0x235   :  { %p544_p1 = scmp.ne.s32.totalorder %s804_s3, %s543_s25  ;;  %p547_p2 = scmp.lt.u32.totalorder %s543_s25, %s804_s3 }
 0x237   :  { %p549_p3 = pnand %p547_p2, %p544_p1 }
 0x239   :  { %552 = shalt.err (!%p549_p3)
}
 0x23a   :  { %301 = dma.vmem_to_hbm [thread:$0]  %s299_s19, 16, %s804_s3, [#allocation4]  }
 0x23b   :  { %557 = dma.done.wait [#allocation4], 16  }
 0x23c   :  { %558 = vsyncadd [#allocation4], 4294967280 }
 0x23d   :  { %305 = vsyncpa [#allocation3], 1 }
 0x23e   :  { %306 = vsyncpa [#allocation6], 1 }
 0x23f   :  { %307 = vsyncpa [#allocation4], 1 }

</bundles_post_ra>
